<compile_context>
chip_gen: v5e
topology: v5e:2x2
jax: 0.10.0
libtpu: 0.0.40
codegen_flags: <defaults>
</compile_context>

<pallas_src>
import jax
import jax.numpy as jnp
from jax.experimental import pallas as pl
from jax.experimental.pallas import tpu as pltpu


def _round_up(x, n):
    return (x + n - 1) // n * n


def _gen_budget():
    """(tm_max, vmem_limit_bytes) picked per TPU generation (VMEM capacity)."""
    try:
        vmem_bytes = int(pltpu.get_tpu_info().vmem_capacity_bytes)
    except Exception:
        vmem_bytes = 64 << 20                      # unknown -> conservative
    if vmem_bytes >= (100 << 20):                  # v5e / v6e: 128 MiB VMEM
        return 2048, 64 << 20
    return 1024, 40 << 20                          # v7x: 64 MiB per TensorCore


# ----------------------------------------------------------------------------
# Pallas kernel: one matmul, two outputs (a_mask and 1 - a_mask variants)
# ----------------------------------------------------------------------------
def _ptr_dense_pair_kernel(x_ref, m_ref, w_ref, rd_ref, out_ref, inv_ref):
    # x_ref  : (tm, H)   compute dtype (bf16 default)
    # m_ref  : (tm, 1)   f32 aspect mask in {0,1}
    # w_ref  : (H, Dp)   compute dtype, grid-resident
    # rd_ref : (2, Dp)   f32, grid-resident; row0 = r0 = PTR[0]@W+b,
    #                                        row1 = delta = (PTR[1]-PTR[0])@W
    # out_ref/inv_ref : (tm, Dp)
    y = jnp.dot(x_ref[...], w_ref[...], preferred_element_type=jnp.float32)
    m = m_ref[...]                                  # (tm, 1)
    r0 = rd_ref[0:1, :]                             # (1, Dp)
    delta = rd_ref[1:2, :]                          # (1, Dp)
    md = m * delta                                  # (tm, Dp)  single VPU mul
    out_val = y + r0 + md
    out_ref[...] = out_val.astype(out_ref.dtype)
    # flipped mask: y + r0 + (1-m)*delta = out_val + (1 - 2m)*delta
    inv_ref[...] = (out_val + (delta - md) - md).astype(inv_ref.dtype)


def ptr_dense_pair(bert_out, a_mask, ptr_table, w, b, *,
                   compute_dtype=jnp.bfloat16, out_dtype=jnp.float32):
    """Fused PtrEncoding + Linear for BOTH a_mask and 1-a_mask in one kernel.

    bert_out: [B,S,H], a_mask: [B,S] in {0,1}, ptr_table: [2,H],
    w: [H,Dout], b: [Dout].  Returns (out, inv_out), each [B,S,Dout] out_dtype.
    """
    B, S, H = bert_out.shape
    Dout = w.shape[1]
    M = B * S

    tm_max, vmem_limit = _gen_budget()
    Dp = _round_up(Dout, 128)                       # lane-dense output width

    # Algebraic precompute (f32): (x + PTR[m]) @ W + b == x@W + (PTR[m]@W + b)
    rows = ptr_table.astype(jnp.float32) @ w.astype(jnp.float32) \
        + b.astype(jnp.float32)[None, :]            # (2, Dout)
    rd = jnp.stack([rows[0], rows[1] - rows[0]], axis=0)   # [r0, delta]

    if Dp != Dout:                                  # only pads the tiny weight
        w = jnp.pad(w, ((0, 0), (0, Dp - Dout)))
        rd = jnp.pad(rd, ((0, 0), (0, Dp - Dout)))

    x = bert_out.reshape(M, H).astype(compute_dtype)   # bf16 default -> 1/2 DMA
    wq = w.astype(compute_dtype)
    m = a_mask.reshape(M, 1).astype(jnp.float32)

    # Tile: >=2 grid steps (keeps both v7x TensorCores busy), cap by tm_max and
    # by a VMEM footprint estimate (x/m/out double-buffered, W/rd resident).
    in_b = jnp.dtype(compute_dtype).itemsize
    out_b = jnp.dtype(out_dtype).itemsize
    tm = min(tm_max, _round_up(max(pl.cdiv(M, 2), 8), 8))

    def _footprint(t):
        return (2 * t * H * in_b + 2 * t * 128 * 4          # x, m (lane-padded)
                + 2 * H * Dp * in_b + 2 * 2 * Dp * 4        # W, rd
                + 2 * 2 * t * Dp * out_b)                   # two outputs

    while tm > 8 and _footprint(tm) > int(0.8 * vmem_limit):
        tm = _round_up(tm // 2, 8)

    grid = (pl.cdiv(M, tm),)                        # ragged tail handled by Pallas

    cost = pl.CostEstimate(
        flops=2 * M * H * Dp,
        transcendentals=0,
        bytes_accessed=(M * H * in_b + M * 4 + H * Dp * in_b + 2 * Dp * 4
                        + 2 * M * Dp * out_b),
    )

    def _call(single_buffer_resident):
        resident_kw = {}
        if single_buffer_resident:
            # W / rd never change block index -> single buffer reclaims VMEM
            resident_kw = dict(pipeline_mode=pl.Buffered(1))
        in_specs = [
            pl.BlockSpec((tm, H), lambda i: (i, 0)),        # x tile
            pl.BlockSpec((tm, 1), lambda i: (i, 0)),        # mask tile
            pl.BlockSpec((H, Dp), lambda i: (0, 0), **resident_kw),
            pl.BlockSpec((2, Dp), lambda i: (0, 0), **resident_kw),
        ]
        return pl.pallas_call(
            _ptr_dense_pair_kernel,
            out_shape=(jax.ShapeDtypeStruct((M, Dp), out_dtype),
                       jax.ShapeDtypeStruct((M, Dp), out_dtype)),
            grid=grid,
            in_specs=in_specs,
            out_specs=(pl.BlockSpec((tm, Dp), lambda i: (i, 0)),
                       pl.BlockSpec((tm, Dp), lambda i: (i, 0))),
            compiler_params=pltpu.CompilerParams(
                dimension_semantics=("parallel",),
                vmem_limit_bytes=vmem_limit,
            ),
            cost_estimate=cost,
        )(x, m, wq, rd)

    try:
        out, inv = _call(True)
    except Exception:
        # pipeline_mode / Buffered(1) unsupported on this jax version -> default
        out, inv = _call(False)

    if Dp != Dout:                                  # only when Dout % 128 != 0
        out = out[:, :Dout]
        inv = inv[:, :Dout]
    return out.reshape(B, S, Dout), inv.reshape(B, S, Dout)


# ----------------------------------------------------------------------------
# Plain-JAX glue mirroring the PyTorch forward
# ----------------------------------------------------------------------------
def sequence_mask(lengths, max_len):
    """boolean [batch, max_len]; True where position >= length (padding).
    Matches the PyTorch sequence_mask polarity.  max_len must be static."""
    ar = jnp.arange(max_len, dtype=lengths.dtype)
    return ar[None, :] >= lengths[:, None]


def double_encoder_forward(params, adj, bert_out_origin, a_mask, lengths,
                           relation_matrix=None):
    """Mirrors DoubleEncoder.forward for the parts implementable without the
    external pretrained BERT / RGATEncoder modules."""
    S = bert_out_origin.shape[1]

    mask = (adj == 0) if adj is not None else None                 # adj.eq(0)
    key_padding_mask = sequence_mask(lengths, S) if lengths is not None else None

    if relation_matrix is not None:
        dep_relation_embs = jnp.take(params["dep_emb"], relation_matrix, axis=0)
    else:
        dep_relation_embs = None

    # ptr_graph_encode(bert_out_origin, a_mask) and (..., 1 - a_mask), fused.
    bert_out, inv_bert_out = ptr_dense_pair(
        bert_out_origin, a_mask,
        params["ptr_table"], params["dense_w"], params["dense_b"])

    # TODO(synk): graph_out / inv_graph_out would come from RGATEncoder(bert_out, ...)
    return bert_out, inv_bert_out, key_padding_mask, mask, dep_relation_embs


def init_params(key, hidden_dim, bert_out_dim, dep_vocab, dep_dim):
    k1, k2, k3, k4 = jax.random.split(key, 4)
    scale_dense = (2.0 / (hidden_dim + bert_out_dim)) ** 0.5       # xavier-ish
    return {
        "ptr_table": 0.02 * jax.random.normal(k1, (2, hidden_dim), jnp.float32),
        "dense_w": scale_dense * jax.random.normal(k2, (hidden_dim, bert_out_dim),
                                                   jnp.float32),
        "dense_b": 0.01 * jax.random.normal(k3, (bert_out_dim,), jnp.float32),
        "dep_emb": 0.02 * jax.random.normal(k4, (dep_vocab, dep_dim), jnp.float32),
    }


if __name__ == "__main__":
    B, S = 2, 16
    HIDDEN_DIM = 32        # args.hidden_dim (BERT hidden size stand-in)
    BERT_OUT_DIM = 128     # args.bert_out_dim; multiple of 128 -> no pad/slice
    DEP_VOCAB, DEP_DIM = 8, 16

    key = jax.random.PRNGKey(0)
    kp, kx, km, ka, kr = jax.random.split(key, 5)

    params = init_params(kp, HIDDEN_DIM, BERT_OUT_DIM, DEP_VOCAB, DEP_DIM)

    # Synthetic stand-in for bert_out[:, 0:max(l), :]
    bert_out_origin = jax.random.normal(kx, (B, S, HIDDEN_DIM), jnp.float32)
    a_mask = jax.random.bernoulli(km, 0.4, (B, S)).astype(jnp.int32)
    adj = jax.random.bernoulli(ka, 0.3, (B, S, S)).astype(jnp.int32)
    relation_matrix = jax.random.randint(kr, (B, S, S), 0, DEP_VOCAB)
    lengths = jnp.array([S, S - 4], dtype=jnp.int32)

    outs = double_encoder_forward(params, adj, bert_out_origin, a_mask,
                                  lengths, relation_matrix)
    outs = jax.block_until_ready(outs)
    bert_out, inv_bert_out, key_padding_mask, mask, dep_embs = outs

    assert bert_out.shape == (B, S, BERT_OUT_DIM)
    assert inv_bert_out.shape == (B, S, BERT_OUT_DIM)
    assert key_padding_mask.shape == (B, S)
    assert mask.shape == (B, S, S)
    assert dep_embs.shape == (B, S, S, DEP_DIM)

    # Pure-JAX reference.
    ref = (bert_out_origin
           + jnp.take(params["ptr_table"], a_mask, axis=0)) @ params["dense_w"] \
          + params["dense_b"]
    ref_inv = (bert_out_origin
               + jnp.take(params["ptr_table"], 1 - a_mask, axis=0)) @ params["dense_w"] \
              + params["dense_b"]

    # Default path: bf16 MXU inputs, f32 accumulation/output -> loose tolerance.
    assert jnp.allclose(bert_out, ref, atol=2e-2, rtol=2e-2)
    assert jnp.allclose(inv_bert_out, ref_inv, atol=2e-2, rtol=2e-2)

    # Exactness check: same kernel with f32 compute.
    o32, i32 = ptr_dense_pair(bert_out_origin, a_mask, params["ptr_table"],
                              params["dense_w"], params["dense_b"],
                              compute_dtype=jnp.float32)
    jax.block_until_ready((o32, i32))
    assert jnp.allclose(o32, ref, atol=1e-4, rtol=1e-4)
    assert jnp.allclose(i32, ref_inv, atol=1e-4, rtol=1e-4)

    # bf16-output option (for a downstream consumer that tolerates it).
    ob, ib = ptr_dense_pair(bert_out_origin, a_mask, params["ptr_table"],
                            params["dense_w"], params["dense_b"],
                            out_dtype=jnp.bfloat16)
    jax.block_until_ready((ob, ib))
    assert ob.dtype == jnp.bfloat16 and ib.dtype == jnp.bfloat16
    assert jnp.allclose(ob.astype(jnp.float32), ref, atol=3e-2, rtol=3e-2)
    assert jnp.allclose(ib.astype(jnp.float32), ref_inv, atol=3e-2, rtol=3e-2)

    print("KERNEL_OK")
</pallas_src>

<mosaic_0001>
module attributes {stable_mosaic.version = 11 : i64} {
  func.func @_ptr_dense_pair_kernel(%arg0: i32, %arg1: memref<16x32xbf16, #tpu.memory_space<vmem>>, %arg2: memref<16x1xf32, #tpu.memory_space<vmem>>, %arg3: memref<32x128xbf16, #tpu.memory_space<vmem>>, %arg4: memref<2x128xf32, #tpu.memory_space<vmem>>, %arg5: memref<16x128xf32, #tpu.memory_space<vmem>>, %arg6: memref<16x128xf32, #tpu.memory_space<vmem>>) attributes {dimension_semantics = [#tpu.dimension_semantics<parallel>], iteration_bounds = array<i64: 2>, scalar_prefetch = 0 : i64, scratch_operands = 0 : i64, tpu.core_type = #tpu.core_type<tc>, window_params = [{transform_indices = @transform_0, window_bounds = array<i64: 16, 32>}, {transform_indices = @transform_1, window_bounds = array<i64: 16, 1>}, {pipeline_mode = #tpu.pipeline_mode<synchronous>, transform_indices = @transform_2, window_bounds = array<i64: 32, 128>}, {pipeline_mode = #tpu.pipeline_mode<synchronous>, transform_indices = @transform_3, window_bounds = array<i64: 2, 128>}, {transform_indices = @transform_4, window_bounds = array<i64: 16, 128>}, {transform_indices = @transform_5, window_bounds = array<i64: 16, 128>}]} {
    %c0 = arith.constant 0 : index
    %c0_0 = arith.constant 0 : index
    %0 = vector.load %arg1[%c0, %c0_0] : memref<16x32xbf16, #tpu.memory_space<vmem>>, vector<16x32xbf16>
    %c0_1 = arith.constant 0 : index
    %c0_2 = arith.constant 0 : index
    %1 = vector.load %arg3[%c0_1, %c0_2] : memref<32x128xbf16, #tpu.memory_space<vmem>>, vector<32x128xbf16>
    %cst = arith.constant dense<0.000000e+00> : vector<16x128xf32>
    %2 = tpu.matmul %0, %1, %cst {dimension_numbers = #tpu.dot_dimension_numbers<[1], [0], [0], [1], [0, 0, 1, 1], [], []>} : vector<16x32xbf16>, vector<32x128xbf16>, vector<16x128xf32> -> vector<16x128xf32>
    %c0_3 = arith.constant 0 : index
    %c0_4 = arith.constant 0 : index
    %3 = vector.load %arg2[%c0_3, %c0_4] : memref<16x1xf32, #tpu.memory_space<vmem>>, vector<16x1xf32>
    %c0_5 = arith.constant 0 : index
    %c0_6 = arith.constant 0 : index
    %4 = vector.load %arg4[%c0_5, %c0_6] : memref<2x128xf32, #tpu.memory_space<vmem>>, vector<1x128xf32>
    %c1 = arith.constant 1 : index
    %c0_7 = arith.constant 0 : index
    %5 = vector.load %arg4[%c1, %c0_7] : memref<2x128xf32, #tpu.memory_space<vmem>>, vector<1x128xf32>
    %6 = vector.broadcast %3 : vector<16x1xf32> to vector<16x128xf32>
    %7 = vector.broadcast %5 : vector<1x128xf32> to vector<16x128xf32>
    %8 = arith.mulf %6, %7 : vector<16x128xf32>
    %9 = vector.broadcast %4 : vector<1x128xf32> to vector<16x128xf32>
    %10 = arith.addf %2, %9 : vector<16x128xf32>
    %11 = arith.addf %10, %8 : vector<16x128xf32>
    %c0_8 = arith.constant 0 : index
    %c0_9 = arith.constant 0 : index
    %12 = vector.load %arg5[%c0_8, %c0_9] : memref<16x128xf32, #tpu.memory_space<vmem>>, vector<16x128xf32>
    tpu.vector_store %arg5[%c0_8, %c0_9], %11 {strides = array<i32>} : memref<16x128xf32, #tpu.memory_space<vmem>>, vector<16x128xf32>,
    %13 = vector.broadcast %5 : vector<1x128xf32> to vector<16x128xf32>
    %14 = arith.subf %13, %8 : vector<16x128xf32>
    %15 = arith.addf %11, %14 : vector<16x128xf32>
    %16 = arith.subf %15, %8 : vector<16x128xf32>
    %c0_10 = arith.constant 0 : index
    %c0_11 = arith.constant 0 : index
    %17 = vector.load %arg6[%c0_10, %c0_11] : memref<16x128xf32, #tpu.memory_space<vmem>>, vector<16x128xf32>
    tpu.vector_store %arg6[%c0_10, %c0_11], %16 {strides = array<i32>} : memref<16x128xf32, #tpu.memory_space<vmem>>, vector<16x128xf32>,
    return
  }
  func.func @transform_0(%arg0: i32) -> (i32, i32) {
    %c0_i32 = arith.constant 0 : i32
    %c0_i32_0 = arith.constant 0 : i32
    return %arg0, %c0_i32 : i32, i32
  }
  func.func @transform_1(%arg0: i32) -> (i32, i32) {
    %c0_i32 = arith.constant 0 : i32
    %c0_i32_0 = arith.constant 0 : i32
    return %arg0, %c0_i32 : i32, i32
  }
  func.func @transform_2(%arg0: i32) -> (i32, i32) {
    %c0_i32 = arith.constant 0 : i32
    %c0_i32_0 = arith.constant 0 : i32
    %c0_i32_1 = arith.constant 0 : i32
    return %c0_i32, %c0_i32_0 : i32, i32
  }
  func.func @transform_3(%arg0: i32) -> (i32, i32) {
    %c0_i32 = arith.constant 0 : i32
    %c0_i32_0 = arith.constant 0 : i32
    %c0_i32_1 = arith.constant 0 : i32
    return %c0_i32, %c0_i32_0 : i32, i32
  }
  func.func @transform_4(%arg0: i32) -> (i32, i32) {
    %c0_i32 = arith.constant 0 : i32
    %c0_i32_0 = arith.constant 0 : i32
    return %arg0, %c0_i32 : i32, i32
  }
  func.func @transform_5(%arg0: i32) -> (i32, i32) {
    %c0_i32 = arith.constant 0 : i32
    %c0_i32_0 = arith.constant 0 : i32
    return %arg0, %c0_i32 : i32, i32
  }
}

module attributes {stable_mosaic.version = 11 : i64} {
  func.func @_ptr_dense_pair_kernel(%arg0: i32, %arg1: memref<16x32xbf16, #tpu.memory_space<vmem>>, %arg2: memref<16x1xf32, #tpu.memory_space<vmem>>, %arg3: memref<32x128xbf16, #tpu.memory_space<vmem>>, %arg4: memref<2x128xf32, #tpu.memory_space<vmem>>, %arg5: memref<16x128xf32, #tpu.memory_space<vmem>>, %arg6: memref<16x128xf32, #tpu.memory_space<vmem>>) attributes {dimension_semantics = [#tpu.dimension_semantics<parallel>], iteration_bounds = array<i64: 2>, scalar_prefetch = 0 : i64, scratch_operands = 0 : i64, tpu.core_type = #tpu.core_type<tc>, window_params = [{transform_indices = @transform_0, window_bounds = array<i64: 16, 32>}, {transform_indices = @transform_1, window_bounds = array<i64: 16, 1>}, {pipeline_mode = #tpu.pipeline_mode<synchronous>, transform_indices = @transform_2, window_bounds = array<i64: 32, 128>}, {pipeline_mode = #tpu.pipeline_mode<synchronous>, transform_indices = @transform_3, window_bounds = array<i64: 2, 128>}, {transform_indices = @transform_4, window_bounds = array<i64: 16, 128>}, {transform_indices = @transform_5, window_bounds = array<i64: 16, 128>}]} {
    %c0 = arith.constant 0 : index
    %c0_0 = arith.constant 0 : index
    %0 = vector.load %arg1[%c0, %c0_0] : memref<16x32xbf16, #tpu.memory_space<vmem>>, vector<16x32xbf16>
    %c0_1 = arith.constant 0 : index
    %c0_2 = arith.constant 0 : index
    %1 = vector.load %arg3[%c0_1, %c0_2] : memref<32x128xbf16, #tpu.memory_space<vmem>>, vector<32x128xbf16>
    %cst = arith.constant dense<0.000000e+00> : vector<16x128xf32>
    %2 = tpu.matmul %0, %1, %cst {dimension_numbers = #tpu.dot_dimension_numbers<[1], [0], [0], [1], [0, 0, 1, 1], [], []>} : vector<16x32xbf16>, vector<32x128xbf16>, vector<16x128xf32> -> vector<16x128xf32>
    %c0_3 = arith.constant 0 : index
    %c0_4 = arith.constant 0 : index
    %3 = vector.load %arg2[%c0_3, %c0_4] : memref<16x1xf32, #tpu.memory_space<vmem>>, vector<16x1xf32>
    %c0_5 = arith.constant 0 : index
    %c0_6 = arith.constant 0 : index
    %4 = vector.load %arg4[%c0_5, %c0_6] : memref<2x128xf32, #tpu.memory_space<vmem>>, vector<1x128xf32>
    %c1 = arith.constant 1 : index
    %c0_7 = arith.constant 0 : index
    %5 = vector.load %arg4[%c1, %c0_7] : memref<2x128xf32, #tpu.memory_space<vmem>>, vector<1x128xf32>
    %6 = vector.broadcast %3 : vector<16x1xf32> to vector<16x128xf32>
    %7 = vector.broadcast %5 : vector<1x128xf32> to vector<16x128xf32>
    %8 = arith.mulf %6, %7 : vector<16x128xf32>
    %9 = vector.broadcast %4 : vector<1x128xf32> to vector<16x128xf32>
    %10 = arith.addf %2, %9 : vector<16x128xf32>
    %11 = arith.addf %10, %8 : vector<16x128xf32>
    %c0_8 = arith.constant 0 : index
    %c0_9 = arith.constant 0 : index
    %12 = vector.load %arg5[%c0_8, %c0_9] : memref<16x128xf32, #tpu.memory_space<vmem>>, vector<16x128xf32>
    tpu.vector_store %arg5[%c0_8, %c0_9], %11 {strides = array<i32>} : memref<16x128xf32, #tpu.memory_space<vmem>>, vector<16x128xf32>,
    %13 = vector.broadcast %5 : vector<1x128xf32> to vector<16x128xf32>
    %14 = arith.subf %13, %8 : vector<16x128xf32>
    %15 = arith.addf %11, %14 : vector<16x128xf32>
    %16 = arith.subf %15, %8 : vector<16x128xf32>
    %c0_10 = arith.constant 0 : index
    %c0_11 = arith.constant 0 : index
    %17 = vector.load %arg6[%c0_10, %c0_11] : memref<16x128xf32, #tpu.memory_space<vmem>>, vector<16x128xf32>
    tpu.vector_store %arg6[%c0_10, %c0_11], %16 {strides = array<i32>} : memref<16x128xf32, #tpu.memory_space<vmem>>, vector<16x128xf32>,
    return
  }
  func.func @transform_0(%arg0: i32) -> (i32, i32) {
    %c0_i32 = arith.constant 0 : i32
    %c0_i32_0 = arith.constant 0 : i32
    return %arg0, %c0_i32 : i32, i32
  }
  func.func @transform_1(%arg0: i32) -> (i32, i32) {
    %c0_i32 = arith.constant 0 : i32
    %c0_i32_0 = arith.constant 0 : i32
    return %arg0, %c0_i32 : i32, i32
  }
  func.func @transform_2(%arg0: i32) -> (i32, i32) {
    %c0_i32 = arith.constant 0 : i32
    %c0_i32_0 = arith.constant 0 : i32
    %c0_i32_1 = arith.constant 0 : i32
    return %c0_i32, %c0_i32_0 : i32, i32
  }
  func.func @transform_3(%arg0: i32) -> (i32, i32) {
    %c0_i32 = arith.constant 0 : i32
    %c0_i32_0 = arith.constant 0 : i32
    %c0_i32_1 = arith.constant 0 : i32
    return %c0_i32, %c0_i32_0 : i32, i32
  }
  func.func @transform_4(%arg0: i32) -> (i32, i32) {
    %c0_i32 = arith.constant 0 : i32
    %c0_i32_0 = arith.constant 0 : i32
    return %arg0, %c0_i32 : i32, i32
  }
  func.func @transform_5(%arg0: i32) -> (i32, i32) {
    %c0_i32 = arith.constant 0 : i32
    %c0_i32_0 = arith.constant 0 : i32
    return %arg0, %c0_i32 : i32, i32
  }
}

</mosaic_0001>

<bundles_post_ra>
// kernel: tpu_custom_call.1
= control target key start
LH: loop header
LB: loop body
LE: loop exit
PB: predicated region body
PF: predicated region fallthrough
CT: control target
= control target key end

     0   :  { %11 = vsyncpa [#allocation3], 0  ;;  %s820_s0 = inlined_call_operand.vmem [shape: bf16[32,32], index: 0, kind: input, shape index: {}]   ;;  %s821_s1 = inlined_call_operand.vmem [shape: f32[32,1], index: 1, kind: input, shape index: {}]   ;;  %s822_s2 = inlined_call_operand.vmem [shape: bf16[32,128], index: 2, kind: input, shape index: {}]   ;;  %s823_s3 = inlined_call_operand.vmem [shape: f32[2,128], index: 3, kind: input, shape index: {}]   ;;  %s824_s4 = inlined_call_operand.hbm [shape: f32[32,128], index: 4, kind: output, shape index: {0}]   ;;  %s825_s5 = inlined_call_operand.hbm [shape: f32[32,128], index: 5, kind: output, shape index: {1}]  }
   0x1   :  { %13 = vsyncpa [#allocation3 + $0x1], 0 }
   0x2   :  { %14 = vsyncpa [#allocation5], 0 }
   0x3   :  { %16 = vsyncpa [#allocation5 + $0x1], 0  ;;  %s692_s18 = smov 0   ;;  %s694_s19 = smov 0  }
   0x4   :  { %s696_s20 = smov 0   ;;  %s698_s21 = smov 0  }
   0x5 LB: > { %s713_s22 = sadd.s32 4294967295, %s657_s21   ;;  %s477_s23 = sadd.s32 4294967294, %s657_s21   ;;  %s657_s21 = sphi %s698_s21, %s831_s21   ;;  %s653_s20 = sphi %s696_s20, %s830_s20   ;;  %s649_s19 = sphi %s694_s19, %s829_s19   ;;  %s645_s18 = sphi %s692_s18, %s828_s18  }
   0x6   : > { %s717_s24 = sadd.s32 1, %s657_s21   ;;  %s123_s25 = sadd.s32 1, %s653_s20 }
   0x7   : > { %s120_s26 = ssub.s32 %s657_s21, %s717_s24  ;;  %p133_p0 = scmp.ne.s32.totalorder %s653_s20, %s649_s19 }
   0x8   : > { %p121_p1 = scmp.eq.s32.totalorder %s120_s26, 0  ;;  %p134_p2 = scmp.eq.s32.totalorder %s713_s22, 1 }
   0x9   : > { %p139_p3 = scmp.ne.s32.totalorder %s649_s19, %s645_s18  ;;  %p140_p4 = scmp.eq.s32.totalorder %s477_s23, 1 }
   0xa   : > { %s728_s27 = scalar_select %p121_p1, %s653_s20, %s123_s25  }
   0xb   : > { %p730_p5 = por %p134_p2, %p133_p0  ;;  %p734_p6 = por %p140_p4, %p139_p3 }
   0xc   : > { %p480_p7 = scmp.ge.s32.totalorder %s657_s21, 1  ;;  %p208_p8 = scmp.lt.s32.totalorder %s657_s21, 3 }
   0xe   : > { %p209_p9 = pnand %p480_p7, %p208_p8 }
   0xf   : > { %s483_s7 = sshll.u32 (!%p209_p9), %s713_s22, 1  ;;  %s757_s26 = sand.u32 (!%p209_p9), 1, %s649_s19  }
  0x10   : > { %212 = sbr.rel (%p209_p9) target bundleno = 183 (0xb7), region = 36  ;;  %p247_p10 = scmp.lt.s32.totalorder (!%p209_p9), %s483_s7, 3 }
  0x11   : > { %s511_s8 = sshll.u32 (!%p209_p9), %s713_s22, 4  ;;  %s333_s30 = scalar_lea.sflag (!%p209_p9), [#allocation3], %s757_s26 }
  0x12   : > { %s366_s23 = scalar_lea.hbm (!%p209_p9), %s825_s5, %s511_s8 }
  0x13   : > { %s369_s25 = sshll.u32 (!%p209_p9), %s366_s23, 4  ;;  %s370_s25 = int_to_ptr.hbm [resolvable:$true] %s369_s25 }
  0x15   : > { %v510_v0 = vld [vmem:[%s822_s2 + $0x8] sm:$0xff]  ;;  %v659_v1 = vmov 0   ;;  %v509_v2 = vld [vmem:[%s822_s2] sm:$0xff]  ;;  %s833_s7 = smov (!%p247_p10, %s483_s7), 3  ;;  %vm302_vm0 = vcmask 261120  }
  0x16   : > { %560 = vset.pattern.permute.xlu0 %v659_v1  ;;  %312 = vmatpush.bf16.msra.mxu0 %v510_v0  ;;  %s484_s10 = sshll.u32 %s833_s7, 2  ;;  %s486_s11 = sshll.u32 %s833_s7, 3  ;;  %v561_v6 = vld [vmem:[%s823_s3 + $0x1] ss:$0 sm:$0xff]  ;;  %v562_v9 = vld [vmem:[%s823_s3] ss:$0 sm:$0xff] }
  0x17   : > { %s250_s14 = scalar_lea.vmem %s820_s0, %s484_s10  ;;  %s256_s17 = scalar_lea.vmem %s821_s1, %s486_s11 }
  0x18   : > { %v508_v3 = vld [vmem:[%s250_s14] sm:$0xff]  ;;  %v268_v5 = vld [vmem:[%s256_s17 + $0x8] sm:$0xff]  ;;  %s481_s7 = sshll.u32 %s757_s26, 4  ;;  %s349_s11 = scalar_lea.hbm %s824_s4, %s511_s8 }
  0x19   : > { %v267_v4 = vld [vmem:[%s256_s17] sm:$0xff]  ;;  %s238_s12 = scalar_lea.vmem [#allocation2], %s481_s7  ;;  %s352_s14 = sshll.u32 %s349_s11, 4  ;;  %s353_s14 = int_to_ptr.hbm [resolvable:$true] %s352_s14 }
  0x1a   : > { %313 = vmatpush.bf16.msra.mxu0 %v509_v2  ;;  %273 = vperm.xlu0 %560, %v267_v4   ;;  %s350_s13 = sshll.u32 %s238_s12, 4  ;;  %s767_s15 = scalar_lea.vmem [#allocation4], %s481_s7  ;;  %s771_s13 = int_to_ptr.vmem [resolvable:$true] %s350_s13 }
  0x1b   : > { %s367_s16 = sshll.u32 %s767_s15, 4  ;;  %s577_s6 = sshra.s32 %s353_s14, 4  ;;  %s776_s16 = int_to_ptr.vmem [resolvable:$true] %s367_s16  ;;  %s578_s6 = int_to_ptr.hbm [resolvable:$true] %s577_s6 }
  0x1c   : > { %s579_s7 = scalar_lea.hbm %s578_s6, 16  ;;  %s583_s8 = scalar_lea.hbm %s824_s4, 32 }
  0x1d   : > { %499 = vmatmul.msk.bf16.vlgmr.msra.gmra.mxu0 %vm302_vm0, %v508_v3  ;;  %p580_p11 = scmp.ne.s32.totalorder %s578_s6, %s579_s7  ;;  %p584_p0 = scmp.lt.s32.totalorder %s578_s6, %s824_s4 }
  0x1e   : > { %p585_p1 = scmp.lt.s32.totalorder %s583_s8, %s579_s7 }
  0x1f   : > { %p581_p12 = pnand %p580_p11, %p730_p5 }
  0x20   : > { %p586_p2 = por %p585_p1, %p584_p0 }
  0x21   : > { %p582_p13 = pneg %p581_p12 }
  0x22   : > { %278 = vperm.xlu0 %560, %v268_v5  }
  0x23   : > { %p587_p3 = pnand %p586_p2, %p582_p13 }
  0x8c   : > { %v274_v7 = vpop.permute.xlu0 %273 }
  0x8d   : > { %v282_v8 = vmul.f32 %v561_v6, %v274_v7 }
  0x8f   : > { %v324_v11 = vsub.f32 %v561_v6, %v282_v8 }
  0x94   : > { %v279_v14 = vpop.permute.xlu0 %278 }
  0x95   : > { %v283_v16 = vmul.f32 %v561_v6, %v279_v14 }
  0x97   : > { %v325_v20 = vsub.f32 %v561_v6, %v283_v16 }
  0x9a   : > { %v315_v10 = vpop.f32.mrf.mxu0 }
  0x9b   : > { %v316_v12 = vadd.f32 %v562_v9, %v315_v10 }
  0x9d   : > { %v320_v13 = vadd.f32 %v316_v12, %v282_v8 }
  0x9f   : > { %322 = vst [vmem:[%s238_s12] sm:$0xff] %v320_v13  ;;  %v326_v15 = vadd.f32 %v324_v11, %v320_v13 }
  0xa1   : > { %v328_v17 = vsub.f32 %v326_v15, %v282_v8 }
  0xa2   : > { %v317_v18 = vpop.f32.mrf.mxu0 }
  0xa3   : > { %330 = vst [vmem:[%s767_s15] sm:$0xff] %v328_v17  ;;  %v318_v19 = vadd.f32 %v562_v9, %v317_v18 }
  0xa5   : > { %v321_v21 = vadd.f32 %v318_v19, %v283_v16 }
  0xa7   : > { %323 = vst [vmem:[%s238_s12 + $0x8] sm:$0xff] %v321_v21  ;;  %v327_v22 = vadd.f32 %v325_v20, %v321_v21 }
  0xa8   : > { %590 = shalt.err (!%p587_p3)
}
  0xa9   : > { %s660_s12 = smov 128   ;;  %s661_s17 = smov 8   ;;  %v329_v23 = vsub.f32 %v327_v22, %v283_v16 }
  0xaa   : > { %513 = dma.vmem_to_hbm [thread:$0]  (%p730_p5), %s771_s13, 256, %s353_s14, %s333_s30, %s660_s12, %s660_s12, %s661_s17  }
  0xab   : > { %331 = vst [vmem:[%s767_s15 + $0x8] sm:$0xff] %v329_v23  ;;  %s338_s23 = scalar_lea.sflag [#allocation5], %s757_s26  ;;  %s605_s9 = sshra.s32 %s370_s25, 4  ;;  %s606_s9 = int_to_ptr.hbm [resolvable:$true] %s605_s9 }
  0xac   : > { %s607_s6 = scalar_lea.hbm %s606_s9, 16  ;;  %s611_s8 = scalar_lea.hbm %s825_s5, 32 }
  0xad   : > { %p608_p4 = scmp.ne.s32.totalorder %s606_s9, %s607_s6  ;;  %p612_p9 = scmp.lt.s32.totalorder %s606_s9, %s825_s5 }
  0xae   : > { %p613_p10 = scmp.lt.s32.totalorder %s611_s8, %s607_s6 }
  0xaf   : > { %p609_p7 = pnand %p608_p4, %p730_p5 }
  0xb0   : > { %p614_p11 = por %p613_p10, %p612_p9 }
  0xb1   : > { %p610_p8 = pneg %p609_p7 }
  0xb3   : > { %p615_p12 = pnand %p614_p11, %p610_p8 }
  0xb5   : > { %618 = shalt.err (!%p615_p12)
}
  0xb6   : > { %514 = dma.vmem_to_hbm [thread:$0]  (%p730_p5), %s776_s16, 256, %s370_s25, %s338_s23, %s660_s12, %s660_s12, %s661_s17  }
  0xb7 PF: > { %p524_p13 = scmp.ge.s32.totalorder %s657_s21, 2  ;;  %s384_s26 = sand.u32 1, %s645_s18  }
  0xb8   : > { %s385_s13 = scalar_lea.sflag [#allocation3], %s384_s26 }
  0xb9   : > { %p518_p0 = pnand %p524_p13, %p734_p6 }
  0xbb   : > { %p519_p1 = pneg %p518_p0 }
  0xbd   : > { %636 = dma.done.wait (%p519_p1), %s385_s13, 256  }
  0xbe   : > { %638 = vsyncadd (%p519_p1), %s385_s13, 4294967040  ;;  %s395_s14 = scalar_lea.sflag [#allocation5], %s384_s26 }
  0xbf   : > { %640 = dma.done.wait (%p519_p1), %s395_s14, 256  }
  0xc0   : > { %642 = vsyncadd (%p519_p1), %s395_s14, 4294967040  ;;  %p19_p5 = scmp.ge.s32.totalorder %s717_s24, 4   ;;  %s828_s18 = smov %s649_s19 }
  0xc1   : > { %s829_s19 = smov %s653_s20  ;;  %s830_s20 = smov %s728_s27 }
  0xc2   : > { %s831_s21 = smov %s717_s24  ;;  %21 = sbr.rel (!%p19_p5) target bundleno = 5 (0x5), region = 91 }
  0xc7   :  { %401 = vsyncpa [#allocation3], 1 }
  0xc8   :  { %403 = vsyncpa [#allocation3 + $0x1], 1 }
  0xc9   :  { %404 = vsyncpa [#allocation5], 1 }
  0xca   :  { %406 = vsyncpa [#allocation5 + $0x1], 1 }

// kernel: tpu_custom_call.1
= control target key start
LH: loop header
LB: loop body
LE: loop exit
PB: predicated region body
PF: predicated region fallthrough
CT: control target
= control target key end

     0   :  { %11 = vsyncpa [#allocation3], 0  ;;  %s820_s0 = inlined_call_operand.vmem [shape: bf16[32,32], index: 0, kind: input, shape index: {}]   ;;  %s821_s1 = inlined_call_operand.vmem [shape: f32[32,1], index: 1, kind: input, shape index: {}]   ;;  %s822_s2 = inlined_call_operand.vmem [shape: bf16[32,128], index: 2, kind: input, shape index: {}]   ;;  %s823_s3 = inlined_call_operand.vmem [shape: f32[2,128], index: 3, kind: input, shape index: {}]   ;;  %s824_s4 = inlined_call_operand.hbm [shape: f32[32,128], index: 4, kind: output, shape index: {0}]   ;;  %s825_s5 = inlined_call_operand.hbm [shape: f32[32,128], index: 5, kind: output, shape index: {1}]  }
   0x1   :  { %13 = vsyncpa [#allocation3 + $0x1], 0 }
   0x2   :  { %14 = vsyncpa [#allocation5], 0 }
   0x3   :  { %16 = vsyncpa [#allocation5 + $0x1], 0  ;;  %s692_s18 = smov 0   ;;  %s694_s19 = smov 0  }
   0x4   :  { %s696_s20 = smov 0   ;;  %s698_s21 = smov 0  }
   0x5 LB: > { %s713_s22 = sadd.s32 4294967295, %s657_s21   ;;  %s477_s23 = sadd.s32 4294967294, %s657_s21   ;;  %s657_s21 = sphi %s698_s21, %s831_s21   ;;  %s653_s20 = sphi %s696_s20, %s830_s20   ;;  %s649_s19 = sphi %s694_s19, %s829_s19   ;;  %s645_s18 = sphi %s692_s18, %s828_s18  }
   0x6   : > { %s717_s24 = sadd.s32 1, %s657_s21   ;;  %s123_s25 = sadd.s32 1, %s653_s20 }
   0x7   : > { %s120_s26 = ssub.s32 %s657_s21, %s717_s24  ;;  %p133_p0 = scmp.ne.s32.totalorder %s653_s20, %s649_s19 }
   0x8   : > { %p121_p1 = scmp.eq.s32.totalorder %s120_s26, 0  ;;  %p134_p2 = scmp.eq.s32.totalorder %s713_s22, 1 }
   0x9   : > { %p139_p3 = scmp.ne.s32.totalorder %s649_s19, %s645_s18  ;;  %p140_p4 = scmp.eq.s32.totalorder %s477_s23, 1 }
   0xa   : > { %s728_s27 = scalar_select %p121_p1, %s653_s20, %s123_s25  }
   0xb   : > { %p730_p5 = por %p134_p2, %p133_p0  ;;  %p734_p6 = por %p140_p4, %p139_p3 }
   0xc   : > { %p480_p7 = scmp.ge.s32.totalorder %s657_s21, 1  ;;  %p208_p8 = scmp.lt.s32.totalorder %s657_s21, 3 }
   0xe   : > { %p209_p9 = pnand %p480_p7, %p208_p8 }
   0xf   : > { %s483_s7 = sshll.u32 (!%p209_p9), %s713_s22, 1  ;;  %s757_s26 = sand.u32 (!%p209_p9), 1, %s649_s19  }
  0x10   : > { %212 = sbr.rel (%p209_p9) target bundleno = 183 (0xb7), region = 36  ;;  %p247_p10 = scmp.lt.s32.totalorder (!%p209_p9), %s483_s7, 3 }
  0x11   : > { %s511_s8 = sshll.u32 (!%p209_p9), %s713_s22, 4  ;;  %s333_s30 = scalar_lea.sflag (!%p209_p9), [#allocation3], %s757_s26 }
  0x12   : > { %s366_s23 = scalar_lea.hbm (!%p209_p9), %s825_s5, %s511_s8 }
  0x13   : > { %s369_s25 = sshll.u32 (!%p209_p9), %s366_s23, 4  ;;  %s370_s25 = int_to_ptr.hbm [resolvable:$true] %s369_s25 }
  0x15   : > { %v510_v0 = vld [vmem:[%s822_s2 + $0x8] sm:$0xff]  ;;  %v659_v1 = vmov 0   ;;  %v509_v2 = vld [vmem:[%s822_s2] sm:$0xff]  ;;  %s833_s7 = smov (!%p247_p10, %s483_s7), 3  ;;  %vm302_vm0 = vcmask 261120  }
  0x16   : > { %560 = vset.pattern.permute.xlu0 %v659_v1  ;;  %312 = vmatpush.bf16.msra.mxu0 %v510_v0  ;;  %s484_s10 = sshll.u32 %s833_s7, 2  ;;  %s486_s11 = sshll.u32 %s833_s7, 3  ;;  %v561_v6 = vld [vmem:[%s823_s3 + $0x1] ss:$0 sm:$0xff]  ;;  %v562_v9 = vld [vmem:[%s823_s3] ss:$0 sm:$0xff] }
  0x17   : > { %s250_s14 = scalar_lea.vmem %s820_s0, %s484_s10  ;;  %s256_s17 = scalar_lea.vmem %s821_s1, %s486_s11 }
  0x18   : > { %v508_v3 = vld [vmem:[%s250_s14] sm:$0xff]  ;;  %v268_v5 = vld [vmem:[%s256_s17 + $0x8] sm:$0xff]  ;;  %s481_s7 = sshll.u32 %s757_s26, 4  ;;  %s349_s11 = scalar_lea.hbm %s824_s4, %s511_s8 }
  0x19   : > { %v267_v4 = vld [vmem:[%s256_s17] sm:$0xff]  ;;  %s238_s12 = scalar_lea.vmem [#allocation2], %s481_s7  ;;  %s352_s14 = sshll.u32 %s349_s11, 4  ;;  %s353_s14 = int_to_ptr.hbm [resolvable:$true] %s352_s14 }
  0x1a   : > { %313 = vmatpush.bf16.msra.mxu0 %v509_v2  ;;  %273 = vperm.xlu0 %560, %v267_v4   ;;  %s350_s13 = sshll.u32 %s238_s12, 4  ;;  %s767_s15 = scalar_lea.vmem [#allocation4], %s481_s7  ;;  %s771_s13 = int_to_ptr.vmem [resolvable:$true] %s350_s13 }
  0x1b   : > { %s367_s16 = sshll.u32 %s767_s15, 4  ;;  %s577_s6 = sshra.s32 %s353_s14, 4  ;;  %s776_s16 = int_to_ptr.vmem [resolvable:$true] %s367_s16  ;;  %s578_s6 = int_to_ptr.hbm [resolvable:$true] %s577_s6 }
  0x1c   : > { %s579_s7 = scalar_lea.hbm %s578_s6, 16  ;;  %s583_s8 = scalar_lea.hbm %s824_s4, 32 }
  0x1d   : > { %499 = vmatmul.msk.bf16.vlgmr.msra.gmra.mxu0 %vm302_vm0, %v508_v3  ;;  %p580_p11 = scmp.ne.s32.totalorder %s578_s6, %s579_s7  ;;  %p584_p0 = scmp.lt.s32.totalorder %s578_s6, %s824_s4 }
  0x1e   : > { %p585_p1 = scmp.lt.s32.totalorder %s583_s8, %s579_s7 }
  0x1f   : > { %p581_p12 = pnand %p580_p11, %p730_p5 }
  0x20   : > { %p586_p2 = por %p585_p1, %p584_p0 }
  0x21   : > { %p582_p13 = pneg %p581_p12 }
  0x22   : > { %278 = vperm.xlu0 %560, %v268_v5  }
  0x23   : > { %p587_p3 = pnand %p586_p2, %p582_p13 }
  0x8c   : > { %v274_v7 = vpop.permute.xlu0 %273 }
  0x8d   : > { %v282_v8 = vmul.f32 %v561_v6, %v274_v7 }
  0x8f   : > { %v324_v11 = vsub.f32 %v561_v6, %v282_v8 }
  0x94   : > { %v279_v14 = vpop.permute.xlu0 %278 }
  0x95   : > { %v283_v16 = vmul.f32 %v561_v6, %v279_v14 }
  0x97   : > { %v325_v20 = vsub.f32 %v561_v6, %v283_v16 }
  0x9a   : > { %v315_v10 = vpop.f32.mrf.mxu0 }
  0x9b   : > { %v316_v12 = vadd.f32 %v562_v9, %v315_v10 }
  0x9d   : > { %v320_v13 = vadd.f32 %v316_v12, %v282_v8 }
  0x9f   : > { %322 = vst [vmem:[%s238_s12] sm:$0xff] %v320_v13  ;;  %v326_v15 = vadd.f32 %v324_v11, %v320_v13 }
  0xa1   : > { %v328_v17 = vsub.f32 %v326_v15, %v282_v8 }
  0xa2   : > { %v317_v18 = vpop.f32.mrf.mxu0 }
  0xa3   : > { %330 = vst [vmem:[%s767_s15] sm:$0xff] %v328_v17  ;;  %v318_v19 = vadd.f32 %v562_v9, %v317_v18 }
  0xa5   : > { %v321_v21 = vadd.f32 %v318_v19, %v283_v16 }
  0xa7   : > { %323 = vst [vmem:[%s238_s12 + $0x8] sm:$0xff] %v321_v21  ;;  %v327_v22 = vadd.f32 %v325_v20, %v321_v21 }
  0xa8   : > { %590 = shalt.err (!%p587_p3)
}
  0xa9   : > { %s660_s12 = smov 128   ;;  %s661_s17 = smov 8   ;;  %v329_v23 = vsub.f32 %v327_v22, %v283_v16 }
  0xaa   : > { %513 = dma.vmem_to_hbm [thread:$0]  (%p730_p5), %s771_s13, 256, %s353_s14, %s333_s30, %s660_s12, %s660_s12, %s661_s17  }
  0xab   : > { %331 = vst [vmem:[%s767_s15 + $0x8] sm:$0xff] %v329_v23  ;;  %s338_s23 = scalar_lea.sflag [#allocation5], %s757_s26  ;;  %s605_s9 = sshra.s32 %s370_s25, 4  ;;  %s606_s9 = int_to_ptr.hbm [resolvable:$true] %s605_s9 }
  0xac   : > { %s607_s6 = scalar_lea.hbm %s606_s9, 16  ;;  %s611_s8 = scalar_lea.hbm %s825_s5, 32 }
  0xad   : > { %p608_p4 = scmp.ne.s32.totalorder %s606_s9, %s607_s6  ;;  %p612_p9 = scmp.lt.s32.totalorder %s606_s9, %s825_s5 }
  0xae   : > { %p613_p10 = scmp.lt.s32.totalorder %s611_s8, %s607_s6 }
  0xaf   : > { %p609_p7 = pnand %p608_p4, %p730_p5 }
  0xb0   : > { %p614_p11 = por %p613_p10, %p612_p9 }
  0xb1   : > { %p610_p8 = pneg %p609_p7 }
  0xb3   : > { %p615_p12 = pnand %p614_p11, %p610_p8 }
  0xb5   : > { %618 = shalt.err (!%p615_p12)
}
  0xb6   : > { %514 = dma.vmem_to_hbm [thread:$0]  (%p730_p5), %s776_s16, 256, %s370_s25, %s338_s23, %s660_s12, %s660_s12, %s661_s17  }
  0xb7 PF: > { %p524_p13 = scmp.ge.s32.totalorder %s657_s21, 2  ;;  %s384_s26 = sand.u32 1, %s645_s18  }
  0xb8   : > { %s385_s13 = scalar_lea.sflag [#allocation3], %s384_s26 }
  0xb9   : > { %p518_p0 = pnand %p524_p13, %p734_p6 }
  0xbb   : > { %p519_p1 = pneg %p518_p0 }
  0xbd   : > { %636 = dma.done.wait (%p519_p1), %s385_s13, 256  }
  0xbe   : > { %638 = vsyncadd (%p519_p1), %s385_s13, 4294967040  ;;  %s395_s14 = scalar_lea.sflag [#allocation5], %s384_s26 }
  0xbf   : > { %640 = dma.done.wait (%p519_p1), %s395_s14, 256  }
  0xc0   : > { %642 = vsyncadd (%p519_p1), %s395_s14, 4294967040  ;;  %p19_p5 = scmp.ge.s32.totalorder %s717_s24, 4   ;;  %s828_s18 = smov %s649_s19 }
  0xc1   : > { %s829_s19 = smov %s653_s20  ;;  %s830_s20 = smov %s728_s27 }
  0xc2   : > { %s831_s21 = smov %s717_s24  ;;  %21 = sbr.rel (!%p19_p5) target bundleno = 5 (0x5), region = 91 }
  0xc7   :  { %401 = vsyncpa [#allocation3], 1 }
  0xc8   :  { %403 = vsyncpa [#allocation3 + $0x1], 1 }
  0xc9   :  { %404 = vsyncpa [#allocation5], 1 }
  0xca   :  { %406 = vsyncpa [#allocation5 + $0x1], 1 }

</bundles_post_ra>
